<compile_context>
chip_gen: v5e
topology: v5e:2x2
jax: 0.10.0
libtpu: 0.0.40
codegen_flags: <defaults>
</compile_context>

<pallas_src>
import functools

import jax
import jax.numpy as jnp
from jax.experimental import pallas as pl
from jax.experimental.pallas import tpu as pltpu

_EPS = 1e-8


def _round_up(x, m):
    return (x + m - 1) // m * m


def _fuse_l2norm_kernel(v_inst_ref, v_conc_ref, t_inst_ref, t_conc_ref,
                        v_out_ref, t_out_ref, *, alpha, fuse_type):
    """One row tile: fuse (weight_sum / multiple) + exact L2 norm, both modalities.

    Compute happens in f32 on the loaded vregs; HBM I/O stays in the native dtype.
    """

    def _fuse_one(inst_ref, conc_ref, out_ref):
        inst = inst_ref[...].astype(jnp.float32)
        conc = conc_ref[...].astype(jnp.float32)
        if fuse_type == "weight_sum":
            fused = alpha * inst + (1.0 - alpha) * conc
        else:  # "multiple"
            fused = inst * conc
        norm = jnp.sqrt(jnp.sum(fused * fused, axis=-1, keepdims=True)) + _EPS
        out_ref[...] = (fused / norm).astype(out_ref.dtype)

    _fuse_one(v_inst_ref, v_conc_ref, v_out_ref)
    _fuse_one(t_inst_ref, t_conc_ref, t_out_ref)


def multi_feature_fusing(v_emb_instance, t_emb_instance, v_emb_concept, t_emb_concept,
                         *, alpha=0.75, fuse_type="weight_sum", tm=512):
    """Pallas implementation of Multi_feature_fusing.forward for 'weight_sum' / 'multiple'.

    All four inputs are (batch, embed_dim) and share dtype/shape.
    Returns (v_fused, t_fused), each (batch, embed_dim) in the input dtype.
    """
    assert fuse_type in ("weight_sum", "multiple"), \
        "only 'weight_sum' and 'multiple' fuse types are supported by this kernel"
    assert v_emb_instance.shape == t_emb_instance.shape == \
           v_emb_concept.shape == t_emb_concept.shape
    B, D = v_emb_instance.shape
    dtype = v_emb_instance.dtype
    itemsize = jnp.dtype(dtype).itemsize

    # ---------------- row-tile selection (VMEM- and megacore-aware) ----------------
    tm = max(8, (int(tm) // 8) * 8)            # row tile must be a multiple of 8
    # Double-buffered working set per grid step: 6 streams (4 in + 2 out) x 2 buffers.
    vmem_budget = 24 << 20                     # keeps full buffering even on v7x (64 MiB VMEM)
    per_row_bytes = 12 * D * itemsize
    tm_cap = max(8, (vmem_budget // per_row_bytes) // 8 * 8)
    tm_eff = min(tm, tm_cap)
    # Guarantee >= 2 grid steps once there is enough work, so the "parallel" axis
    # can shard across v7x's 2 TensorCores.
    if B >= 256:
        tm_eff = min(tm_eff, _round_up(-(-B // 2), 8))
    if B <= tm_eff:
        tm_eff = B                             # single full-extent row block (any B is legal)
    n_tiles = pl.cdiv(B, tm_eff)               # trailing partial block is masked on writeback

    # Full-extent embed-dim block: no padding needed. If D % 128 != 0 the stores are
    # lane-masked (minor cost); the common 512/1024-dim case is fully lane-dense.
    blk = pl.BlockSpec((tm_eff, D), lambda i: (i, 0))

    kernel = functools.partial(_fuse_l2norm_kernel,
                               alpha=float(alpha), fuse_type=fuse_type)

    elems = B * D
    cost = pl.CostEstimate(
        flops=2 * 4 * elems,                   # 2 modalities, ~4 VPU flops / element
        transcendentals=2 * B,                 # one sqrt per row per modality
        bytes_accessed=6 * elems * itemsize,   # 4 inputs + 2 outputs, native dtype
    )

    io_bytes = 12 * tm_eff * D * itemsize
    # Headroom for f32 in-tile temporaries; v5e's scoped default is only 16 MiB.
    vmem_limit = int(min(48 << 20, max(32 << 20, 2 * io_bytes)))

    v_out, t_out = pl.pallas_call(
        kernel,
        out_shape=(jax.ShapeDtypeStruct((B, D), dtype),
                   jax.ShapeDtypeStruct((B, D), dtype)),
        grid_spec=pltpu.PrefetchScalarGridSpec(
            num_scalar_prefetch=0,
            grid=(n_tiles,),
            in_specs=[blk, blk, blk, blk],
            out_specs=(blk, blk),
        ),
        compiler_params=pltpu.CompilerParams(
            dimension_semantics=("parallel",),   # lets v7x shard row tiles over its 2 TCs
            vmem_limit_bytes=vmem_limit),
        cost_estimate=cost,
    )(v_emb_instance, v_emb_concept, t_emb_instance, t_emb_concept)

    return v_out, t_out


# ----------------------------- pure-JAX reference -----------------------------

def _l2norm_ref(x, eps=_EPS):
    norm = jnp.sqrt(jnp.sum(x * x, axis=-1, keepdims=True)) + eps
    return x / norm


def _reference(v_inst, t_inst, v_conc, t_conc, alpha=0.75, fuse_type="weight_sum"):
    if fuse_type == "weight_sum":
        v = alpha * v_inst + (1.0 - alpha) * v_conc
        t = alpha * t_inst + (1.0 - alpha) * t_conc
    else:  # "multiple"
        v = v_inst * v_conc
        t = t_inst * t_conc
    return _l2norm_ref(v), _l2norm_ref(t)


if __name__ == "__main__":
    key = jax.random.PRNGKey(0)
    k1, k2, k3, k4 = jax.random.split(key, 4)

    batch, embed_dim = 2, 32   # small shapes consistent with the module's (batch, emb_dim) inputs

    v_inst = jax.random.normal(k1, (batch, embed_dim), dtype=jnp.float32)
    t_inst = jax.random.normal(k2, (batch, embed_dim), dtype=jnp.float32)
    v_conc = jax.random.normal(k3, (batch, embed_dim), dtype=jnp.float32)
    t_conc = jax.random.normal(k4, (batch, embed_dim), dtype=jnp.float32)

    for ftype in ("weight_sum", "multiple"):
        v_fused, t_fused = multi_feature_fusing(v_inst, t_inst, v_conc, t_conc,
                                                alpha=0.75, fuse_type=ftype)
        v_fused = jax.block_until_ready(v_fused)
        t_fused = jax.block_until_ready(t_fused)

        v_ref, t_ref = _reference(v_inst, t_inst, v_conc, t_conc,
                                  alpha=0.75, fuse_type=ftype)

        assert v_fused.shape == (batch, embed_dim) and t_fused.shape == (batch, embed_dim)
        assert v_fused.dtype == v_inst.dtype and t_fused.dtype == t_inst.dtype
        # Exact (non-approx) normalization -> tight tolerance.
        assert jnp.allclose(v_fused, v_ref, atol=1e-5, rtol=1e-5), \
            f"v_fused mismatch vs reference ({ftype})"
        assert jnp.allclose(t_fused, t_ref, atol=1e-5, rtol=1e-5), \
            f"t_fused mismatch vs reference ({ftype})"

    print("KERNEL_OK")
</pallas_src>

<mosaic_0001>
module attributes {stable_mosaic.version = 11 : i64} {
  func.func @_fuse_l2norm_kernel(%arg0: i32, %arg1: memref<2x32xf32, #tpu.memory_space<vmem>>, %arg2: memref<2x32xf32, #tpu.memory_space<vmem>>, %arg3: memref<2x32xf32, #tpu.memory_space<vmem>>, %arg4: memref<2x32xf32, #tpu.memory_space<vmem>>, %arg5: memref<2x32xf32, #tpu.memory_space<vmem>>, %arg6: memref<2x32xf32, #tpu.memory_space<vmem>>) attributes {dimension_semantics = [#tpu.dimension_semantics<parallel>], iteration_bounds = array<i64: 1>, scalar_prefetch = 0 : i64, scratch_operands = 0 : i64, tpu.core_type = #tpu.core_type<tc>, window_params = [{transform_indices = @transform_0, window_bounds = array<i64: 2, 32>}, {transform_indices = @transform_1, window_bounds = array<i64: 2, 32>}, {transform_indices = @transform_2, window_bounds = array<i64: 2, 32>}, {transform_indices = @transform_3, window_bounds = array<i64: 2, 32>}, {transform_indices = @transform_4, window_bounds = array<i64: 2, 32>}, {transform_indices = @transform_5, window_bounds = array<i64: 2, 32>}]} {
    %c0 = arith.constant 0 : index
    %c0_0 = arith.constant 0 : index
    %0 = vector.load %arg1[%c0, %c0_0] : memref<2x32xf32, #tpu.memory_space<vmem>>, vector<2x32xf32>
    %c0_1 = arith.constant 0 : index
    %c0_2 = arith.constant 0 : index
    %1 = vector.load %arg2[%c0_1, %c0_2] : memref<2x32xf32, #tpu.memory_space<vmem>>, vector<2x32xf32>
    %cst = arith.constant 7.500000e-01 : f32
    %2 = vector.broadcast %cst : f32 to vector<2x32xf32>
    %3 = arith.mulf %2, %0 : vector<2x32xf32>
    %cst_3 = arith.constant 2.500000e-01 : f32
    %4 = vector.broadcast %cst_3 : f32 to vector<2x32xf32>
    %5 = arith.mulf %4, %1 : vector<2x32xf32>
    %6 = arith.addf %3, %5 : vector<2x32xf32>
    %7 = arith.mulf %6, %6 : vector<2x32xf32>
    %cst_4 = arith.constant dense<0.000000e+00> : vector<2xf32>
    %8 = vector.multi_reduction <add>, %7, %cst_4 [1] : vector<2x32xf32> to vector<2xf32>
    %9 = vector.shape_cast %8 : vector<2xf32> to vector<2x1xf32>
    %10 = math.sqrt %9 : vector<2x1xf32>
    %cst_5 = arith.constant 9.99999993E-9 : f32
    %11 = vector.broadcast %cst_5 : f32 to vector<2x1xf32>
    %12 = arith.addf %10, %11 : vector<2x1xf32>
    %13 = vector.broadcast %12 : vector<2x1xf32> to vector<2x32xf32>
    %14 = arith.divf %6, %13 : vector<2x32xf32>
    %c0_6 = arith.constant 0 : index
    %c0_7 = arith.constant 0 : index
    %15 = vector.load %arg5[%c0_6, %c0_7] : memref<2x32xf32, #tpu.memory_space<vmem>>, vector<2x32xf32>
    tpu.vector_store %arg5[%c0_6, %c0_7], %14 {strides = array<i32>} : memref<2x32xf32, #tpu.memory_space<vmem>>, vector<2x32xf32>,
    %c0_8 = arith.constant 0 : index
    %c0_9 = arith.constant 0 : index
    %16 = vector.load %arg3[%c0_8, %c0_9] : memref<2x32xf32, #tpu.memory_space<vmem>>, vector<2x32xf32>
    %c0_10 = arith.constant 0 : index
    %c0_11 = arith.constant 0 : index
    %17 = vector.load %arg4[%c0_10, %c0_11] : memref<2x32xf32, #tpu.memory_space<vmem>>, vector<2x32xf32>
    %cst_12 = arith.constant 7.500000e-01 : f32
    %18 = vector.broadcast %cst_12 : f32 to vector<2x32xf32>
    %19 = arith.mulf %18, %16 : vector<2x32xf32>
    %cst_13 = arith.constant 2.500000e-01 : f32
    %20 = vector.broadcast %cst_13 : f32 to vector<2x32xf32>
    %21 = arith.mulf %20, %17 : vector<2x32xf32>
    %22 = arith.addf %19, %21 : vector<2x32xf32>
    %23 = arith.mulf %22, %22 : vector<2x32xf32>
    %cst_14 = arith.constant dense<0.000000e+00> : vector<2xf32>
    %24 = vector.multi_reduction <add>, %23, %cst_14 [1] : vector<2x32xf32> to vector<2xf32>
    %25 = vector.shape_cast %24 : vector<2xf32> to vector<2x1xf32>
    %26 = math.sqrt %25 : vector<2x1xf32>
    %cst_15 = arith.constant 9.99999993E-9 : f32
    %27 = vector.broadcast %cst_15 : f32 to vector<2x1xf32>
    %28 = arith.addf %26, %27 : vector<2x1xf32>
    %29 = vector.broadcast %28 : vector<2x1xf32> to vector<2x32xf32>
    %30 = arith.divf %22, %29 : vector<2x32xf32>
    %c0_16 = arith.constant 0 : index
    %c0_17 = arith.constant 0 : index
    %31 = vector.load %arg6[%c0_16, %c0_17] : memref<2x32xf32, #tpu.memory_space<vmem>>, vector<2x32xf32>
    tpu.vector_store %arg6[%c0_16, %c0_17], %30 {strides = array<i32>} : memref<2x32xf32, #tpu.memory_space<vmem>>, vector<2x32xf32>,
    return
  }
  func.func @transform_0(%arg0: i32) -> (i32, i32) {
    %c0_i32 = arith.constant 0 : i32
    %c0_i32_0 = arith.constant 0 : i32
    return %arg0, %c0_i32 : i32, i32
  }
  func.func @transform_1(%arg0: i32) -> (i32, i32) {
    %c0_i32 = arith.constant 0 : i32
    %c0_i32_0 = arith.constant 0 : i32
    return %arg0, %c0_i32 : i32, i32
  }
  func.func @transform_2(%arg0: i32) -> (i32, i32) {
    %c0_i32 = arith.constant 0 : i32
    %c0_i32_0 = arith.constant 0 : i32
    return %arg0, %c0_i32 : i32, i32
  }
  func.func @transform_3(%arg0: i32) -> (i32, i32) {
    %c0_i32 = arith.constant 0 : i32
    %c0_i32_0 = arith.constant 0 : i32
    return %arg0, %c0_i32 : i32, i32
  }
  func.func @transform_4(%arg0: i32) -> (i32, i32) {
    %c0_i32 = arith.constant 0 : i32
    %c0_i32_0 = arith.constant 0 : i32
    return %arg0, %c0_i32 : i32, i32
  }
  func.func @transform_5(%arg0: i32) -> (i32, i32) {
    %c0_i32 = arith.constant 0 : i32
    %c0_i32_0 = arith.constant 0 : i32
    return %arg0, %c0_i32 : i32, i32
  }
}

</mosaic_0001>

<bundles_post_ra>
// kernel: tpu_custom_call.1
= control target key start
LH: loop header
LB: loop body
LE: loop exit
PB: predicated region body
PF: predicated region fallthrough
CT: control target
= control target key end

     0   :  { %11 = vsyncpa [#allocation3], 0  ;;  %s376_s0 = inlined_call_operand.hbm [shape: f32[2,32], index: 0, kind: input, shape index: {}]   ;;  %s377_s1 = inlined_call_operand.hbm [shape: f32[2,32], index: 1, kind: input, shape index: {}]   ;;  %s378_s2 = inlined_call_operand.hbm [shape: f32[2,32], index: 2, kind: input, shape index: {}]   ;;  %s379_s3 = inlined_call_operand.vmem [shape: f32[2,32], index: 3, kind: input, shape index: {}]   ;;  %s380_s4 = inlined_call_operand.hbm [shape: f32[2,32], index: 4, kind: output, shape index: {0}]   ;;  %s381_s5 = inlined_call_operand.hbm [shape: f32[2,32], index: 5, kind: output, shape index: {1}]  }
   0x1   :  { %12 = vsyncpa [#allocation6], 0 }
   0x2   :  { %13 = vsyncpa [#allocation4], 0  ;;  %s31_s20 = sshll.u32 %s377_s1, 4  ;;  %s32_s20 = int_to_ptr.hbm [resolvable:$true] %s31_s20 }
   0x3   :  { %14 = vsyncpa [#allocation10], 0  ;;  %s314_s21 = smov [#allocation5]   ;;  %s20_s25 = sshll.u32 %s376_s0, 4  ;;  %s21_s25 = int_to_ptr.hbm [resolvable:$true] %s20_s25 }
   0x4   :  { %s33_s22 = sshll.u32 %s314_s21, 4  ;;  %s315_s26 = smov [#allocation2]   ;;  %s34_s22 = int_to_ptr.vmem [resolvable:$true] %s33_s22 }
   0x5   :  { %36 = dma.hbm_to_vmem [thread:$0]  %s32_s20, 32, %s34_s22, [#allocation6]  }
   0x6   :  { %s22_s27 = sshll.u32 %s315_s26, 4  ;;  %s42_s30 = sshll.u32 %s378_s2, 4  ;;  %s23_s27 = int_to_ptr.vmem [resolvable:$true] %s22_s27  ;;  %s43_s30 = int_to_ptr.hbm [resolvable:$true] %s42_s30 }
   0x7   :  { %25 = dma.hbm_to_vmem [thread:$0]  %s21_s25, 32, %s23_s27, [#allocation3]  }
   0x8   :  { %s316_s1 = smov [#allocation7]  }
   0x9   :  { %s44_s6 = sshll.u32 %s316_s1, 4  ;;  %s45_s6 = int_to_ptr.vmem [resolvable:$true] %s44_s6 }
   0xa   :  { %47 = dma.hbm_to_vmem [thread:$0]  %s43_s30, 32, %s45_s6, [#allocation6]  }
   0xb   :  { %306 = dma.done.wait [#allocation3], 32  }
   0xc   :  { %307 = vsyncadd [#allocation3], 4294967264 }
   0xd   :  { %308 = dma.done.wait [#allocation6], 64  }
   0xe   :  { %309 = vsyncadd [#allocation6], 4294967232  ;;  %v62_v0 = vld [vmem:[#allocation2] sm:$0x3]  ;;  %v63_v1 = vld [vmem:[#allocation5] sm:$0x3] }
   0xf   :  { %v101_v2 = vld [vmem:[#allocation7] sm:$0x3]  ;;  %v64_v3 = vmul.f32 0.75, %v62_v0  ;;  %v65_v4 = vmul.f32 0.25, %v63_v1  ;;  %v102_v5 = vld [vmem:[%s379_s3] sm:$0x3] }
  0x10   :  { %v103_v6 = vmul.f32 0.75, %v101_v2  ;;  %v104_v7 = vmul.f32 0.25, %v102_v5  ;;  %vm68_vm0 = vcmask 254976   ;;  %s317_s2 = smov [#allocation8]   ;;  %s146_s10 = sshll.u32 %s380_s4, 4  ;;  %s147_s10 = int_to_ptr.hbm [resolvable:$true] %s146_s10 }
  0x11   :  { %v66_v8 = vadd.f32 %v65_v4, %v64_v3  ;;  %s144_s3 = sshll.u32 %s317_s2, 4  ;;  %s318_s4 = smov [#allocation9]   ;;  %s145_s3 = int_to_ptr.vmem [resolvable:$true] %s144_s3 }
  0x12   :  { %v361_v10 = vadd.f32 %v104_v7, %v103_v6  ;;  %s155_s11 = sshll.u32 %s318_s4, 4  ;;  %s157_s14 = sshll.u32 %s381_s5, 4  ;;  %s156_s11 = int_to_ptr.vmem [resolvable:$true] %s155_s11  ;;  %s158_s14 = int_to_ptr.hbm [resolvable:$true] %s157_s14 }
  0x13   :  { %v67_v9 = vmul.f32 %v66_v8, %v66_v8 }
  0x14   :  { %v106_v12 = vmul.f32 %v361_v10, %v361_v10 }
  0x15   :  { %v69_v11 = vsel %vm68_vm0, %v67_v9, 0.0 }
  0x16   :  { %70 = vadd.xlane.f32.xlu0 %v69_v11  ;;  %v107_v13 = vsel %vm68_vm0, %v106_v12, 0.0 }
  0x1e   :  { %108 = vadd.xlane.f32.xlu0 %v107_v13 }
  0x89   :  { %v71_v14 = vpop.xlane.xlu0 %70 }
  0x8a   :  { %178 = vrsqrt.f32 %v71_v14  ;;  %vm79_vm1 = vcmp.eq.f32.partialorder %v71_v14, inf  ;;  %v82_v26 = vand.u32 2147483648, %v71_v14  ;;  %vm81_vm2 = vcmp.eq.f32.partialorder %v71_v14, 0.0 }
  0x90   :  { %v179_v15 = vpop.eup %178 }
  0x91   :  { %v73_v16 = vmul.f32 %v179_v15, %v71_v14  ;;  %v109_v17 = vpop.xlane.xlu0 %108 }
  0x92   :  { %180 = vrsqrt.f32 %v109_v17  ;;  %vm117_vm3 = vcmp.eq.f32.partialorder %v109_v17, inf  ;;  %v120_v34 = vand.u32 2147483648, %v109_v17  ;;  %vm119_vm4 = vcmp.eq.f32.partialorder %v109_v17, 0.0 }
  0x93   :  { %v74_v18 = vmul.f32 %v179_v15, %v73_v16 }
  0x95   :  { %v75_v19 = vmul.f32 0.5, %v74_v18 }
  0x97   :  { %v76_v20 = vsub.f32 1.5, %v75_v19 }
  0x98   :  { %v181_v21 = vpop.eup %180 }
  0x99   :  { %v77_v22 = vmul.f32 %v179_v15, %v76_v20  ;;  %v111_v23 = vmul.f32 %v181_v21, %v109_v17 }
  0x9b   :  { %v78_v24 = vmul.f32 %v77_v22, %v71_v14  ;;  %v112_v25 = vmul.f32 %v181_v21, %v111_v23 }
  0x9d   :  { %v80_v27 = vsel %vm79_vm1, %v71_v14, %v78_v24  ;;  %v113_v28 = vmul.f32 0.5, %v112_v25 }
  0x9e   :  { %v83_v29 = vsel %vm81_vm2, %v82_v26, %v80_v27 }
  0x9f   :  { %v84_v30 = vadd.f32 1e-08, %v83_v29  ;;  %v114_v31 = vsub.f32 1.5, %v113_v28 }
  0xa1   :  { %182 = vrcp.f32 %v84_v30  ;;  %v115_v32 = vmul.f32 %v181_v21, %v114_v31  ;;  %v96_v41 = vand.u32 2147483648, %v84_v30  ;;  %v94_v43 = vand.u32 2147483647, %v84_v30 }
  0xa2   :  { %vm90_vm6 = vweird.f32 %v84_v30 }
  0xa3   :  { %v116_v33 = vmul.f32 %v115_v32, %v109_v17  ;;  %v97_v46 = vor.u32 1.1754944e-38, %v96_v41  ;;  %vm95_vm8 = vcmp.eq.f32.partialorder %v94_v43, 8.507059e+37 }
  0xa5   :  { %v118_v35 = vsel %vm117_vm3, %v109_v17, %v116_v33 }
  0xa6   :  { %v121_v36 = vsel %vm119_vm4, %v120_v34, %v118_v35 }
  0xa7   :  { %v183_v37 = vpop.eup %182  ;;  %v122_v38 = vadd.f32 1e-08, %v121_v36 }
  0xa8   :  { %v86_v39 = vmul.f32 %v183_v37, %v84_v30  ;;  %vm91_vm5 = vweird.f32 %v183_v37 }
  0xa9   :  { %184 = vrcp.f32 %v122_v38  ;;  %vm92_vm7 = vmor %vm90_vm6, %vm91_vm5  ;;  %v134_v52 = vand.u32 2147483648, %v122_v38  ;;  %v132_v54 = vand.u32 2147483647, %v122_v38  ;;  %vm128_vm10 = vweird.f32 %v122_v38 }
  0xaa   :  { %v87_v40 = vsub.f32 1.0, %v86_v39 }
  0xab   :  { %v135_v56 = vor.u32 1.1754944e-38, %v134_v52  ;;  %vm133_vm12 = vcmp.eq.f32.partialorder %v132_v54, 8.507059e+37 }
  0xac   :  { %v88_v42 = vmul.f32 %v183_v37, %v87_v40 }
  0xae   :  { %v89_v44 = vadd.f32 %v183_v37, %v88_v42 }
  0xaf   :  { %v185_v45 = vpop.eup %184 }
  0xb0   :  { %v93_v47 = vsel %vm92_vm7, %v183_v37, %v89_v44  ;;  %v124_v48 = vmul.f32 %v185_v45, %v122_v38  ;;  %vm129_vm9 = vweird.f32 %v185_v45 }
  0xb1   :  { %v98_v49 = vsel %vm95_vm8, %v97_v46, %v93_v47  ;;  %vm130_vm11 = vmor %vm128_vm10, %vm129_vm9 }
  0xb2   :  { %v99_v50 = vmul.f32 %v98_v49, %v66_v8  ;;  %v125_v51 = vsub.f32 1.0, %v124_v48 }
  0xb4   :  { %100 = vst.msk [vmem:[#allocation8] sm:$0x3] %vm68_vm0, %v99_v50  ;;  %v126_v53 = vmul.f32 %v185_v45, %v125_v51 }
  0xb5   :  { %149 = dma.vmem_to_hbm [thread:$0]  %s145_s3, 32, %s147_s10, [#allocation4]  }
  0xb6   :  { %v127_v55 = vadd.f32 %v185_v45, %v126_v53 }
  0xb8   :  { %v131_v57 = vsel %vm130_vm11, %v185_v45, %v127_v55 }
  0xb9   :  { %v136_v58 = vsel %vm133_vm12, %v135_v56, %v131_v57 }
  0xba   :  { %v137_v59 = vmul.f32 %v136_v58, %v361_v10 }
  0xbc   :  { %138 = vst.msk [vmem:[#allocation9] sm:$0x3] %vm68_vm0, %v137_v59 }
  0xbd   :  { %160 = dma.vmem_to_hbm [thread:$0]  %s156_s11, 32, %s158_s14, [#allocation10]  }
  0xbe   :  { %310 = dma.done.wait [#allocation4], 32  }
  0xbf   :  { %311 = vsyncadd [#allocation4], 4294967264 }
  0xc0   :  { %312 = dma.done.wait [#allocation10], 32  }
  0xc1   :  { %313 = vsyncadd [#allocation10], 4294967264 }
  0xc2   :  { %169 = vsyncpa [#allocation3], 1 }
  0xc3   :  { %170 = vsyncpa [#allocation6], 1 }
  0xc4   :  { %171 = vsyncpa [#allocation4], 1 }
  0xc5   :  { %172 = vsyncpa [#allocation10], 1 }

</bundles_post_ra>
